<compile_context>
chip_gen: v7x
topology: tpu7x:2x2x1
jax: 0.10.0
libtpu: 0.0.40
codegen_flags: <defaults>
</compile_context>

<pallas_src>
import jax
import jax.numpy as jnp
from jax.experimental import pallas as pl
from jax.experimental.pallas import tpu as pltpu


def discriminator_kernel(x_ref, w1_ref, b1_ref, w2_ref, b2_ref, o_ref):
    # fc1 on the MXU: (TB, D) @ (D, H) + (1, H)
    h = jnp.dot(x_ref[...], w1_ref[...],
                preferred_element_type=jnp.float32) + b1_ref[...]
    # LeakyReLU(0.2): single VALU op.
    h = jnp.maximum(h, 0.2 * h)
    # fc2 as VPU multiply + lane reduce (avoids an N=1 MXU matmul):
    #   (TB, H) * (1, H) --sum over H--> (TB,)
    z = jnp.sum(h * w2_ref[...], axis=-1)
    # Lane-dense row: (1, TB) + (1, 1) bias broadcast.
    z = z[None, :] + b2_ref[...]
    # Sigmoid: exp on EUP, approx reciprocal on EUP (keeps VALU slots free).
    s = pl.reciprocal(1.0 + jnp.exp(-z), approx=True)
    o_ref[...] = s.astype(o_ref.dtype)


def prepare_params(w1, b1, w2, b2):
    """One-time repack of PyTorch-layout params into kernel layout.

    w1: (H, D), b1: (H,), w2: (1, H), b2: (1,)  ->
    w1t: (D, H), b1r: (1, H), w2r: (1, H), b2r: (1, 1)
    """
    H, D = w1.shape
    return (jnp.asarray(w1).T,
            jnp.asarray(b1).reshape(1, H),
            jnp.asarray(w2).reshape(1, H),
            jnp.asarray(b2).reshape(1, 1))


def _round_up(x, m):
    return (x + m - 1) // m * m


def discriminator_forward(x, params, *, block_b=128):
    """x: (B, D); params from prepare_params. Returns (B, 1) = sigmoid(fc2(lrelu(fc1(x))))."""
    w1t, b1r, w2r, b2r = params
    B, D = x.shape
    H = w1t.shape[1]

    # Batch tile: up to 128 rows (sublane-aligned), pad B to a multiple of it.
    TB = min(block_b, _round_up(B, 8))
    Bp = _round_up(B, TB)
    if Bp != B:
        x = jnp.pad(x, ((0, Bp - B), (0, 0)))
    ntiles = Bp // TB

    out = pl.pallas_call(
        discriminator_kernel,
        out_shape=jax.ShapeDtypeStruct((ntiles, TB), x.dtype),
        grid=(ntiles,),
        in_specs=[
            pl.BlockSpec((TB, D), lambda i: (i, 0)),   # x tile (pipelined)
            pl.BlockSpec((D, H), lambda i: (0, 0)),    # w1t resident
            pl.BlockSpec((1, H), lambda i: (0, 0)),    # b1 resident
            pl.BlockSpec((1, H), lambda i: (0, 0)),    # w2 row resident
            pl.BlockSpec((1, 1), lambda i: (0, 0)),    # b2 resident
        ],
        # Lane-dense output: one (1, TB) row per batch tile.
        out_specs=pl.BlockSpec((1, TB), lambda i: (i, 0)),
        compiler_params=pltpu.CompilerParams(
            dimension_semantics=("parallel",)),
    )(x, w1t, b1r, w2r, b2r)

    # (ntiles, TB) -> (Bp,) -> drop padding -> (B, 1)
    return out.reshape(-1)[:B].reshape(B, 1)


def _reference(x, w1, b1, w2, b2):
    h = x @ w1.T + b1
    h = jnp.where(h > 0, h, 0.2 * h)
    return jax.nn.sigmoid(h @ w2.T + b2)


if __name__ == "__main__":
    # Small shapes implied by the module: batch=8, input_dim=16, hidden_dim=32.
    B, D, H = 8, 16, 32

    key = jax.random.PRNGKey(0)
    kx, k1, k2, k3, k4 = jax.random.split(key, 5)

    x = jax.random.normal(kx, (B, D), dtype=jnp.float32)
    w1 = jax.random.uniform(k1, (H, D), minval=-1.0, maxval=1.0) / jnp.sqrt(D)
    b1 = jax.random.uniform(k2, (H,), minval=-1.0, maxval=1.0) / jnp.sqrt(D)
    w2 = jax.random.uniform(k3, (1, H), minval=-1.0, maxval=1.0) / jnp.sqrt(H)
    b2 = jax.random.uniform(k4, (1,), minval=-1.0, maxval=1.0) / jnp.sqrt(H)

    params = prepare_params(w1, b1, w2, b2)

    # Single small-batch invocation (matches the module's implied shapes).
    out = discriminator_forward(x, params)
    jax.block_until_ready(out)
    ref = _reference(x, w1, b1, w2, b2)
    assert out.shape == (B, 1)
    err = float(jnp.max(jnp.abs(out - ref)))
    # Tolerance accounts for the approximate EUP reciprocal in the sigmoid.
    assert err < 1e-2, f"max abs err {err}"

    # Larger, non-multiple batch exercises the multi-tile grid + padding path.
    B2 = 260
    x2 = jax.random.normal(jax.random.PRNGKey(1), (B2, D), dtype=jnp.float32)
    out2 = discriminator_forward(x2, params)
    jax.block_until_ready(out2)
    ref2 = _reference(x2, w1, b1, w2, b2)
    assert out2.shape == (B2, 1)
    err2 = float(jnp.max(jnp.abs(out2 - ref2)))
    assert err2 < 1e-2, f"max abs err (tiled) {err2}"

    print("KERNEL_OK")
</pallas_src>

<mosaic_0001>
module attributes {stable_mosaic.version = 11 : i64} {
  func.func @discriminator_kernel(%arg0: i32, %arg1: memref<8x16xf32, #tpu.memory_space<vmem>>, %arg2: memref<16x32xf32, #tpu.memory_space<vmem>>, %arg3: memref<1x32xf32, #tpu.memory_space<vmem>>, %arg4: memref<1x32xf32, #tpu.memory_space<vmem>>, %arg5: memref<1x1xf32, #tpu.memory_space<vmem>>, %arg6: memref<1x8xf32, #tpu.memory_space<vmem>>) attributes {dimension_semantics = [#tpu.dimension_semantics<parallel>], iteration_bounds = array<i64: 1>, scalar_prefetch = 0 : i64, scratch_operands = 0 : i64, tpu.core_type = #tpu.core_type<tc>, window_params = [{transform_indices = @transform_0, window_bounds = array<i64: 8, 16>}, {pipeline_mode = #tpu.pipeline_mode<synchronous>, transform_indices = @transform_1, window_bounds = array<i64: 16, 32>}, {pipeline_mode = #tpu.pipeline_mode<synchronous>, transform_indices = @transform_2, window_bounds = array<i64: 1, 32>}, {pipeline_mode = #tpu.pipeline_mode<synchronous>, transform_indices = @transform_3, window_bounds = array<i64: 1, 32>}, {pipeline_mode = #tpu.pipeline_mode<synchronous>, transform_indices = @transform_4, window_bounds = array<i64: 1, 1>}, {transform_indices = @transform_5, window_bounds = array<i64: 1, 8>}]} {
    %c0 = arith.constant 0 : index
    %c0_0 = arith.constant 0 : index
    %0 = vector.load %arg1[%c0, %c0_0] : memref<8x16xf32, #tpu.memory_space<vmem>>, vector<8x16xf32>
    %c0_1 = arith.constant 0 : index
    %c0_2 = arith.constant 0 : index
    %1 = vector.load %arg2[%c0_1, %c0_2] : memref<16x32xf32, #tpu.memory_space<vmem>>, vector<16x32xf32>
    %cst = arith.constant dense<0.000000e+00> : vector<8x32xf32>
    %2 = tpu.matmul %0, %1, %cst {dimension_numbers = #tpu.dot_dimension_numbers<[1], [0], [0], [1], [0, 0, 1, 1], [], []>} : vector<8x16xf32>, vector<16x32xf32>, vector<8x32xf32> -> vector<8x32xf32>
    %c0_3 = arith.constant 0 : index
    %c0_4 = arith.constant 0 : index
    %3 = vector.load %arg3[%c0_3, %c0_4] : memref<1x32xf32, #tpu.memory_space<vmem>>, vector<1x32xf32>
    %4 = vector.broadcast %3 : vector<1x32xf32> to vector<8x32xf32>
    %5 = arith.addf %2, %4 : vector<8x32xf32>
    %cst_5 = arith.constant 2.000000e-01 : f32
    %6 = vector.broadcast %cst_5 : f32 to vector<8x32xf32>
    %7 = arith.mulf %6, %5 : vector<8x32xf32>
    %8 = arith.maximumf %5, %7 : vector<8x32xf32>
    %c0_6 = arith.constant 0 : index
    %c0_7 = arith.constant 0 : index
    %9 = vector.load %arg4[%c0_6, %c0_7] : memref<1x32xf32, #tpu.memory_space<vmem>>, vector<1x32xf32>
    %10 = vector.broadcast %9 : vector<1x32xf32> to vector<8x32xf32>
    %11 = arith.mulf %8, %10 : vector<8x32xf32>
    %cst_8 = arith.constant dense<0.000000e+00> : vector<8xf32>
    %12 = vector.multi_reduction <add>, %11, %cst_8 [1] : vector<8x32xf32> to vector<8xf32>
    %13 = vector.shape_cast %12 : vector<8xf32> to vector<1x8xf32>
    %c0_9 = arith.constant 0 : index
    %c0_10 = arith.constant 0 : index
    %14 = vector.load %arg5[%c0_9, %c0_10] : memref<1x1xf32, #tpu.memory_space<vmem>>, vector<1x1xf32>
    %15 = vector.broadcast %14 : vector<1x1xf32> to vector<1x8xf32>
    %16 = arith.addf %13, %15 : vector<1x8xf32>
    %cst_11 = arith.constant 0.000000e+00 : f32
    %17 = vector.broadcast %cst_11 : f32 to vector<1x8xf32>
    %18 = arith.subf %17, %16 : vector<1x8xf32>
    %19 = math.exp %18 : vector<1x8xf32>
    %cst_12 = arith.constant 1.000000e+00 : f32
    %20 = vector.broadcast %cst_12 : f32 to vector<1x8xf32>
    %21 = arith.addf %20, %19 : vector<1x8xf32>
    %22 = tpu.reciprocal %21 {approx = true} : vector<1x8xf32> -> vector<1x8xf32>
    %c0_13 = arith.constant 0 : index
    %c0_14 = arith.constant 0 : index
    %23 = vector.load %arg6[%c0_13, %c0_14] : memref<1x8xf32, #tpu.memory_space<vmem>>, vector<1x8xf32>
    tpu.vector_store %arg6[%c0_13, %c0_14], %22 {strides = array<i32>} : memref<1x8xf32, #tpu.memory_space<vmem>>, vector<1x8xf32>,
    return
  }
  func.func @transform_0(%arg0: i32) -> (i32, i32) {
    %c0_i32 = arith.constant 0 : i32
    %c0_i32_0 = arith.constant 0 : i32
    return %arg0, %c0_i32 : i32, i32
  }
  func.func @transform_1(%arg0: i32) -> (i32, i32) {
    %c0_i32 = arith.constant 0 : i32
    %c0_i32_0 = arith.constant 0 : i32
    %c0_i32_1 = arith.constant 0 : i32
    return %c0_i32, %c0_i32_0 : i32, i32
  }
  func.func @transform_2(%arg0: i32) -> (i32, i32) {
    %c0_i32 = arith.constant 0 : i32
    %c0_i32_0 = arith.constant 0 : i32
    %c0_i32_1 = arith.constant 0 : i32
    return %c0_i32, %c0_i32_0 : i32, i32
  }
  func.func @transform_3(%arg0: i32) -> (i32, i32) {
    %c0_i32 = arith.constant 0 : i32
    %c0_i32_0 = arith.constant 0 : i32
    %c0_i32_1 = arith.constant 0 : i32
    return %c0_i32, %c0_i32_0 : i32, i32
  }
  func.func @transform_4(%arg0: i32) -> (i32, i32) {
    %c0_i32 = arith.constant 0 : i32
    %c0_i32_0 = arith.constant 0 : i32
    %c0_i32_1 = arith.constant 0 : i32
    return %c0_i32, %c0_i32_0 : i32, i32
  }
  func.func @transform_5(%arg0: i32) -> (i32, i32) {
    %c0_i32 = arith.constant 0 : i32
    %c0_i32_0 = arith.constant 0 : i32
    return %arg0, %c0_i32 : i32, i32
  }
}

</mosaic_0001>

<bundles_post_ra>
// kernel: tpu_custom_call.1
= control target key start
LH: loop header
LB: loop body
LE: loop exit
PB: predicated region body
PF: predicated region fallthrough
CT: control target
= control target key end

     0   :  { %s382_s0 = inlined_call_operand.hbm [shape: f32[8,16], index: 0, kind: input, shape index: {}]   ;;  %s383_s1 = inlined_call_operand.hbm [shape: f32[16,32], index: 1, kind: input, shape index: {}]   ;;  %s384_s2 = inlined_call_operand.vmem [shape: f32[1,32], index: 2, kind: input, shape index: {}]   ;;  %s385_s3 = inlined_call_operand.vmem [shape: f32[1,32], index: 3, kind: input, shape index: {}]   ;;  %s386_s4 = inlined_call_operand.<no memory space> [shape: f32[1,1], index: 4, kind: input, shape index: {}]   ;;  %s387_s5 = inlined_call_operand.hbm [shape: f32[1,8], index: 5, kind: output, shape index: {}]  }
   0x1   :  { %v10_v0 = vstv %s386_s4 }
   0x2   :  { %11 = vst [vmem:[#allocation2] sm:$0x1] %v10_v0 }
   0x3   :  { %12 = vsyncpa [#allocation4], 0 }
   0x4   :  { %13 = vsyncpa [#allocation7], 0 }
   0x5   :  { %14 = vsyncpa [#allocation5], 0  ;;  %s291_s20 = smov [#allocation3]   ;;  %s292_s22 = smov [#allocation6]  }
   0x6   :  { %s21_s21 = sshll.u32 %s291_s20, 4  ;;  %s30_s23 = sshll.u32 %s292_s22, 4  ;;  %s22_s21 = int_to_ptr.vmem [resolvable:$true] %s21_s21  ;;  %s333_s23 = int_to_ptr.vmem [resolvable:$true] %s30_s23 }
   0x7   :  { %s219_s26 = scalar_lea.hbm %s382_s0, 128 }
   0x8   :  { %p220_p0 = scmp.ne.s32.totalorder %s382_s0, %s219_s26  ;;  %p223_p1 = scmp.lt.u32.totalorder %s219_s26, %s382_s0 }
   0xa   :  { %p225_p2 = pnand %p223_p1, %p220_p0 }
   0xc   :  { %228 = shalt.err (!%p225_p2)
}
   0xd   :  { %s229_s30 = scalar_lea.vmem %s22_s21, 128  ;;  %p234_p4 = scmp.lt.s32.totalorder %s22_s21, %s22_s21 }
   0xe   :  { %p230_p3 = scmp.ne.s32.totalorder %s22_s21, %s229_s30  ;;  %p235_p5 = scmp.lt.s32.totalorder %s229_s30, %s229_s30 }
  0x10   :  { %p236_p6 = por %p235_p5, %p234_p4 }
  0x12   :  { %p237_p7 = pnand %p236_p6, %p230_p3 }
  0x14   :  { %240 = shalt.err (!%p237_p7)
}
  0x15   :  { %24 = dma.hbm_to_vmem [thread:$0]  %s382_s0, 128, %s22_s21, [#allocation4]  }
  0x16   :  { %s241_s10 = scalar_lea.hbm %s383_s1, 256 }
  0x17   :  { %p242_p8 = scmp.ne.s32.totalorder %s383_s1, %s241_s10  ;;  %p245_p9 = scmp.lt.u32.totalorder %s241_s10, %s383_s1 }
  0x19   :  { %p247_p10 = pnand %p245_p9, %p242_p8 }
  0x1b   :  { %250 = shalt.err (!%p247_p10)
}
  0x1c   :  { %s251_s15 = scalar_lea.vmem %s333_s23, 256  ;;  %p256_p12 = scmp.lt.s32.totalorder %s333_s23, %s333_s23 }
  0x1d   :  { %p252_p11 = scmp.ne.s32.totalorder %s333_s23, %s251_s15  ;;  %p257_p13 = scmp.lt.s32.totalorder %s251_s15, %s251_s15 }
  0x1f   :  { %p258_p0 = por %p257_p13, %p256_p12 }
  0x21   :  { %p259_p1 = pnand %p258_p0, %p252_p11 }
  0x23   :  { %262 = shalt.err (!%p259_p1)
}
  0x24   :  { %s293_s0 = smov 128   ;;  %s294_s16 = smov 8  }
  0x25   :  { %36 = dma.hbm_to_vmem [thread:$0]  %s383_s1, 256, %s333_s23, [#allocation7], %s293_s0, %s293_s0, %s294_s16  }
  0x26   :  { %285 = dma.done.wait [#allocation4], 128  }
  0x27   :  { %286 = vsyncadd [#allocation4], 4294967168 }
  0x28   :  { %287 = dma.done.wait [#allocation7], 256  }
  0x29   :  { %288 = vsyncadd [#allocation7], 4294967040  ;;  %v295_v1 = vmov 0.0|0.0   ;;  %vm296_vm0 = vmmov 0   ;;  %v297_v2 = vmov 0.0   ;;  %v50_v3 = vld [vmem:[#allocation6] sm:$0xff]  ;;  %v153_v18 = vlaneseq }
  0x2a   :  { %202 = vmatprep.subr.bf16.mxu0 %v295_v1  ;;  %199 = vmatprep.mubr.msk.f32.mxu0 %vm296_vm0, %v297_v2  ;;  %v51_v4 = vld [vmem:[#allocation6 + $0x8] sm:$0xff]  ;;  %v49_v6 = vld [vmem:[#allocation3] sm:$0xff]  ;;  %vm59_vm1 = vcmask 130048   ;;  %v298_v7 = vmov 0   ;;  %v189_v8 = vld [vmem:[%s384_s2] ss:$0 sm:$0xff] }
  0x2b   :  { %v203_v5 = vpack.c.bf16 %v51_v4, %v50_v3  ;;  %214 = vset.pattern.permute.xlu0 %v298_v7  ;;  %v191_v13 = vld [vmem:[%s385_s3] ss:$0 sm:$0xff]  ;;  %vm143_vm2 = vcmask 261120   ;;  %v154_v19 = vshrl.u32 %v153_v18, 7  ;;  %v165_v29 = vand.u32 127, %v153_v18  ;;  %s299_s2 = smov [#allocation8]  }
  0x2c   :  { %v147_v17 = vld [vmem:[#allocation2] sm:$0x1]  ;;  %s179_s3 = sshll.u32 %s299_s2, 4  ;;  %vm171_vm3 = vcmask 57344   ;;  %s180_s3 = int_to_ptr.vmem [resolvable:$true] %s179_s3 }
  0x2d   :  { %204 = vmatpush3.bf16.msra.mxu0 %v203_v5  ;;  %v155_v21 = vsub.s32 0, %v154_v19  ;;  %v168_v30 = vsub.s32 %v165_v29, %v154_v19  ;;  %s263_s22 = scalar_lea.vmem %s180_s3, 16  ;;  %s267_s23 = scalar_lea.vmem %s180_s3, 32 }
  0x2e   :  { %p264_p2 = scmp.ne.s32.totalorder %s180_s3, %s263_s22  ;;  %p268_p3 = scmp.lt.s32.totalorder %s180_s3, %s180_s3 }
  0x2f   :  { %p269_p4 = scmp.lt.s32.totalorder %s267_s23, %s263_s22 }
  0x30   :  { %200 = vmatmul.mubr.msk.f32.vlgmr.msra.gmra.mrb[0].mxu0 %vm59_vm1, %v49_v6 }
  0x31   :  { %p270_p5 = por %p269_p4, %p268_p3 }
  0x33   :  { %p271_p6 = pnand %p270_p5, %p264_p2 }
 0x103   :  { %v129_v9 = vpop.f32.mrb[0].mxu0 }
 0x104   :  { %v130_v10 = vadd.f32 %v189_v8, %v129_v9  ;;  %v201_v11 = vpop.f32.mrb[1].mxu0 }
 0x106   :  { %v133_v12 = vmul.f32 0.2, %v130_v10 }
 0x108   :  { %v134_v14 = vmax.f32 %v130_v10, %v133_v12 }
 0x10a   :  { %v142_v15 = vmul.f32 %v191_v13, %v134_v14 }
 0x10c   :  { %v144_v16 = vsel %vm143_vm2, %v142_v15, 0.0 }
 0x10d   :  { %145 = vadd.xlane.f32.xlu0 %v144_v16 }
 0x123   :  { %150 = vperm.xlu0 %214, %v147_v17  }
 0x19a   :  { %v146_v20 = vpop.xlane.xlu0 %145 }
 0x1a2   :  { %v151_v22 = vpop.permute.xlu0 %150 }
 0x1a3   :  { %v156_v23 = vrot.slane %v151_v22, %v155_v21 }
 0x1a5   :  { %v157_v24 = vadd.f32 %v156_v23, %v146_v20 }
 0x1a7   :  { %v158_v25 = vsub.f32 0.0, %v157_v24 }
 0x1a9   :  { %v159_v26 = vmul.f32 1.442695, %v158_v25 }
 0x1ab   :  { %215 = vpow2.f32 %v159_v26 }
 0x1b5   :  { %v216_v27 = vpop.eup %215 }
 0x1b6   :  { %v161_v28 = vadd.f32 1.0, %v216_v27 }
 0x1b8   :  { %217 = vrcp.f32 %v161_v28 }
 0x1c2   :  { %v218_v31 = vpop.eup %217 }
 0x1c3   :  { %v169_v32 = vrot.slane %v218_v31, %v168_v30 }
 0x1c5   :  { %172 = vst.msk [vmem:[#allocation8] sm:$0x1] %vm171_vm3, %v169_v32 }
 0x1c6   :  { %274 = shalt.err (!%p271_p6)
}
 0x1c7   :  { %s275_s26 = scalar_lea.hbm %s387_s5, 16 }
 0x1c8   :  { %p276_p7 = scmp.ne.s32.totalorder %s387_s5, %s275_s26  ;;  %p279_p8 = scmp.lt.u32.totalorder %s275_s26, %s387_s5 }
 0x1ca   :  { %p281_p9 = pnand %p279_p8, %p276_p7 }
 0x1cc   :  { %284 = shalt.err (!%p281_p9)
}
 0x1cd   :  { %182 = dma.vmem_to_hbm [thread:$0]  %s180_s3, 16, %s387_s5, [#allocation5]  }
 0x1ce   :  { %289 = dma.done.wait [#allocation5], 16  }
 0x1cf   :  { %290 = vsyncadd [#allocation5], 4294967280 }
 0x1d0   :  { %186 = vsyncpa [#allocation4], 1 }
 0x1d1   :  { %187 = vsyncpa [#allocation7], 1 }
 0x1d2   :  { %188 = vsyncpa [#allocation5], 1 }

</bundles_post_ra>
